<compile_context>
chip_gen: v5e
topology: v5e:2x2
jax: 0.10.0
libtpu: 0.0.40
codegen_flags: <defaults>
</compile_context>

<pallas_src>
import jax
import jax.numpy as jnp
from jax.experimental import pallas as pl
from jax.experimental.pallas import tpu as pltpu

# Problem sizes (from the PyTorch module)
C_IN = 3
C_OUT = 32
K = 3
STRIDE = 1
PAD = 2
L_IN = 64
L_OUT = (L_IN - 1) * STRIDE - 2 * PAD + K   # = 62
KC = K * C_IN                               # = 9 (flattened contraction dim)
L_PAD = 128                                 # lane-dense padded output width


def _convt_hardsig_kernel(x_ref, w_ref, b_ref, o_ref):
    # x_ref: (KC, L_PAD)     f32  im2col tile for one batch element (zero padded)
    # w_ref: (C_OUT, KC)     f32  pre-flipped, pre-scaled (/6) weights
    # b_ref: (C_OUT, 1)      f32  folded bias: (bias + 3) / 6
    # o_ref: (C_OUT, L_PAD)  f32
    x = x_ref[...]
    w = w_ref[...]
    # Contraction dim is only 9 -> 9 broadcast multiply-adds on the VPU
    # (exact f32, no MXU feed/drain latency for a tile this small).
    acc = w[:, 0:1] * x[0:1, :]                       # (C_OUT, L_PAD)
    for r in range(1, KC):                            # static, unrolled
        acc = acc + w[:, r:r + 1] * x[r:r + 1, :]
    o_ref[...] = jnp.clip(acc + b_ref[...], 0.0, 1.0).astype(o_ref.dtype)


def convt_hardsigmoid(x, weight, bias):
    """
    x:      (N, C_IN, L_IN)   f32
    weight: (C_IN, C_OUT, K)  f32  (PyTorch ConvTranspose1d layout)
    bias:   (C_OUT,)          f32
    returns (N, C_OUT, L_OUT) f32
    """
    N = x.shape[0]
    assert x.shape[1] == C_IN and x.shape[2] == L_IN

    # Fold kernel flip + transpose + the /6 into one (C_OUT, K*C_IN) matrix:
    #   w2[o, s*C_IN + c] = weight[c, o, K-1-s] / 6
    w_flip = jnp.flip(weight, axis=-1)                        # (C_IN, C_OUT, K)
    w2 = jnp.transpose(w_flip, (1, 2, 0)).reshape(C_OUT, KC) * (1.0 / 6.0)
    b2 = ((bias + 3.0) * (1.0 / 6.0)).reshape(C_OUT, 1)

    # im2col (layout plumbing, done once in XLA):
    #   xcol[n, s*C_IN + c, j] = x[n, c, j + s], zero-padded to 128 lanes.
    xcol = jnp.concatenate([x[:, :, s:s + L_OUT] for s in range(K)], axis=1)
    xcol = jnp.pad(xcol, ((0, 0), (0, 0), (0, L_PAD - L_OUT)))

    out = pl.pallas_call(
        _convt_hardsig_kernel,
        out_shape=jax.ShapeDtypeStruct((N, C_OUT, L_PAD), jnp.float32),
        grid_spec=pltpu.PrefetchScalarGridSpec(
            num_scalar_prefetch=0,
            grid=(N,),
            in_specs=[
                pl.BlockSpec((None, KC, L_PAD), lambda n: (n, 0, 0)),  # per-batch im2col
                pl.BlockSpec((C_OUT, KC), lambda n: (0, 0)),           # resident weights
                pl.BlockSpec((C_OUT, 1), lambda n: (0, 0)),            # resident bias
            ],
            out_specs=pl.BlockSpec((None, C_OUT, L_PAD), lambda n: (n, 0, 0)),
        ),
        compiler_params=pltpu.CompilerParams(
            dimension_semantics=("parallel",),   # v7x: shard batch across 2 TCs
        ),
    )(xcol, w2, b2)
    return out[:, :, :L_OUT]


def _reference(x, weight, bias):
    # Pure-JAX, elementwise-f32 reference of ConvTranspose1d (stride=1, pad=2)
    # + the hardsigmoid-style clamp (no dot -> no TPU bf16 matmul rounding).
    w_flip = jnp.flip(weight, axis=-1)            # (C_IN, C_OUT, K): [c, o, s]
    acc = jnp.zeros((x.shape[0], C_OUT, L_OUT), jnp.float32)
    for s in range(K):
        for c in range(C_IN):
            acc = acc + w_flip[c, :, s][None, :, None] * x[:, c:c + 1, s:s + L_OUT]
    y = acc + bias[None, :, None]
    return jnp.clip(y + 3.0, 0.0, 6.0) / 6.0


if __name__ == "__main__":
    key = jax.random.PRNGKey(0)
    kx, kw, kb = jax.random.split(key, 3)

    # Deterministic parameter init (matches PyTorch shapes; synthetic values).
    fan_in = C_OUT * K
    bound = 1.0 / (fan_in ** 0.5)
    weight = jax.random.uniform(kw, (C_IN, C_OUT, K), jnp.float32, -bound, bound)
    bias = jax.random.uniform(kb, (C_OUT,), jnp.float32, -bound, bound)

    # Input consistent with the module: (1, 3, 64)
    x = jax.random.normal(kx, (1, C_IN, L_IN), jnp.float32)

    y = jax.block_until_ready(convt_hardsigmoid(x, weight, bias))
    y_ref = _reference(x, weight, bias)

    assert y.shape == (1, C_OUT, L_OUT), y.shape
    assert jnp.allclose(y, y_ref, atol=1e-5, rtol=1e-5), float(
        jnp.max(jnp.abs(y - y_ref)))

    print("KERNEL_OK")
</pallas_src>

<mosaic_0001>
module attributes {stable_mosaic.version = 11 : i64} {
  func.func @_convt_hardsig_kernel(%arg0: i32, %arg1: memref<1x9x128xf32, #tpu.memory_space<vmem>>, %arg2: memref<32x9xf32, #tpu.memory_space<vmem>>, %arg3: memref<32x1xf32, #tpu.memory_space<vmem>>, %arg4: memref<1x32x128xf32, #tpu.memory_space<vmem>>) attributes {dimension_semantics = [#tpu.dimension_semantics<parallel>], iteration_bounds = array<i64: 1>, scalar_prefetch = 0 : i64, scratch_operands = 0 : i64, tpu.core_type = #tpu.core_type<tc>, window_params = [{transform_indices = @transform_0, window_bounds = array<i64: 1, 9, 128>}, {pipeline_mode = #tpu.pipeline_mode<synchronous>, transform_indices = @transform_1, window_bounds = array<i64: 32, 9>}, {pipeline_mode = #tpu.pipeline_mode<synchronous>, transform_indices = @transform_2, window_bounds = array<i64: 32, 1>}, {transform_indices = @transform_3, window_bounds = array<i64: 1, 32, 128>}]} {
    %c0 = arith.constant 0 : index
    %c0_0 = arith.constant 0 : index
    %c0_1 = arith.constant 0 : index
    %0 = vector.load %arg1[%c0, %c0_0, %c0_1] : memref<1x9x128xf32, #tpu.memory_space<vmem>>, vector<1x9x128xf32>
    %1 = vector.shape_cast %0 : vector<1x9x128xf32> to vector<9x128xf32>
    %c0_2 = arith.constant 0 : index
    %c0_3 = arith.constant 0 : index
    %2 = vector.load %arg2[%c0_2, %c0_3] : memref<32x9xf32, #tpu.memory_space<vmem>>, vector<32x9xf32>
    %3 = vector.extract_strided_slice %2 {offsets = [0, 0], sizes = [32, 1], strides = [1, 1]} : vector<32x9xf32> to vector<32x1xf32>
    %4 = vector.extract_strided_slice %1 {offsets = [0, 0], sizes = [1, 128], strides = [1, 1]} : vector<9x128xf32> to vector<1x128xf32>
    %5 = vector.broadcast %3 : vector<32x1xf32> to vector<32x128xf32>
    %6 = vector.broadcast %4 : vector<1x128xf32> to vector<32x128xf32>
    %7 = arith.mulf %5, %6 : vector<32x128xf32>
    %8 = vector.extract_strided_slice %2 {offsets = [0, 1], sizes = [32, 1], strides = [1, 1]} : vector<32x9xf32> to vector<32x1xf32>
    %9 = vector.extract_strided_slice %1 {offsets = [1, 0], sizes = [1, 128], strides = [1, 1]} : vector<9x128xf32> to vector<1x128xf32>
    %10 = vector.broadcast %8 : vector<32x1xf32> to vector<32x128xf32>
    %11 = vector.broadcast %9 : vector<1x128xf32> to vector<32x128xf32>
    %12 = arith.mulf %10, %11 : vector<32x128xf32>
    %13 = arith.addf %7, %12 : vector<32x128xf32>
    %14 = vector.extract_strided_slice %2 {offsets = [0, 2], sizes = [32, 1], strides = [1, 1]} : vector<32x9xf32> to vector<32x1xf32>
    %15 = vector.extract_strided_slice %1 {offsets = [2, 0], sizes = [1, 128], strides = [1, 1]} : vector<9x128xf32> to vector<1x128xf32>
    %16 = vector.broadcast %14 : vector<32x1xf32> to vector<32x128xf32>
    %17 = vector.broadcast %15 : vector<1x128xf32> to vector<32x128xf32>
    %18 = arith.mulf %16, %17 : vector<32x128xf32>
    %19 = arith.addf %13, %18 : vector<32x128xf32>
    %20 = vector.extract_strided_slice %2 {offsets = [0, 3], sizes = [32, 1], strides = [1, 1]} : vector<32x9xf32> to vector<32x1xf32>
    %21 = vector.extract_strided_slice %1 {offsets = [3, 0], sizes = [1, 128], strides = [1, 1]} : vector<9x128xf32> to vector<1x128xf32>
    %22 = vector.broadcast %20 : vector<32x1xf32> to vector<32x128xf32>
    %23 = vector.broadcast %21 : vector<1x128xf32> to vector<32x128xf32>
    %24 = arith.mulf %22, %23 : vector<32x128xf32>
    %25 = arith.addf %19, %24 : vector<32x128xf32>
    %26 = vector.extract_strided_slice %2 {offsets = [0, 4], sizes = [32, 1], strides = [1, 1]} : vector<32x9xf32> to vector<32x1xf32>
    %27 = vector.extract_strided_slice %1 {offsets = [4, 0], sizes = [1, 128], strides = [1, 1]} : vector<9x128xf32> to vector<1x128xf32>
    %28 = vector.broadcast %26 : vector<32x1xf32> to vector<32x128xf32>
    %29 = vector.broadcast %27 : vector<1x128xf32> to vector<32x128xf32>
    %30 = arith.mulf %28, %29 : vector<32x128xf32>
    %31 = arith.addf %25, %30 : vector<32x128xf32>
    %32 = vector.extract_strided_slice %2 {offsets = [0, 5], sizes = [32, 1], strides = [1, 1]} : vector<32x9xf32> to vector<32x1xf32>
    %33 = vector.extract_strided_slice %1 {offsets = [5, 0], sizes = [1, 128], strides = [1, 1]} : vector<9x128xf32> to vector<1x128xf32>
    %34 = vector.broadcast %32 : vector<32x1xf32> to vector<32x128xf32>
    %35 = vector.broadcast %33 : vector<1x128xf32> to vector<32x128xf32>
    %36 = arith.mulf %34, %35 : vector<32x128xf32>
    %37 = arith.addf %31, %36 : vector<32x128xf32>
    %38 = vector.extract_strided_slice %2 {offsets = [0, 6], sizes = [32, 1], strides = [1, 1]} : vector<32x9xf32> to vector<32x1xf32>
    %39 = vector.extract_strided_slice %1 {offsets = [6, 0], sizes = [1, 128], strides = [1, 1]} : vector<9x128xf32> to vector<1x128xf32>
    %40 = vector.broadcast %38 : vector<32x1xf32> to vector<32x128xf32>
    %41 = vector.broadcast %39 : vector<1x128xf32> to vector<32x128xf32>
    %42 = arith.mulf %40, %41 : vector<32x128xf32>
    %43 = arith.addf %37, %42 : vector<32x128xf32>
    %44 = vector.extract_strided_slice %2 {offsets = [0, 7], sizes = [32, 1], strides = [1, 1]} : vector<32x9xf32> to vector<32x1xf32>
    %45 = vector.extract_strided_slice %1 {offsets = [7, 0], sizes = [1, 128], strides = [1, 1]} : vector<9x128xf32> to vector<1x128xf32>
    %46 = vector.broadcast %44 : vector<32x1xf32> to vector<32x128xf32>
    %47 = vector.broadcast %45 : vector<1x128xf32> to vector<32x128xf32>
    %48 = arith.mulf %46, %47 : vector<32x128xf32>
    %49 = arith.addf %43, %48 : vector<32x128xf32>
    %50 = vector.extract_strided_slice %2 {offsets = [0, 8], sizes = [32, 1], strides = [1, 1]} : vector<32x9xf32> to vector<32x1xf32>
    %51 = vector.extract_strided_slice %1 {offsets = [8, 0], sizes = [1, 128], strides = [1, 1]} : vector<9x128xf32> to vector<1x128xf32>
    %52 = vector.broadcast %50 : vector<32x1xf32> to vector<32x128xf32>
    %53 = vector.broadcast %51 : vector<1x128xf32> to vector<32x128xf32>
    %54 = arith.mulf %52, %53 : vector<32x128xf32>
    %55 = arith.addf %49, %54 : vector<32x128xf32>
    %c0_4 = arith.constant 0 : index
    %c0_5 = arith.constant 0 : index
    %56 = vector.load %arg3[%c0_4, %c0_5] : memref<32x1xf32, #tpu.memory_space<vmem>>, vector<32x1xf32>
    %57 = vector.broadcast %56 : vector<32x1xf32> to vector<32x128xf32>
    %58 = arith.addf %55, %57 : vector<32x128xf32>
    %cst = arith.constant 0.000000e+00 : f32
    %cst_6 = arith.constant 1.000000e+00 : f32
    %59 = vector.broadcast %cst : f32 to vector<32x128xf32>
    %60 = arith.maximumf %59, %58 : vector<32x128xf32>
    %61 = vector.broadcast %cst_6 : f32 to vector<32x128xf32>
    %62 = arith.minimumf %61, %60 : vector<32x128xf32>
    %c0_7 = arith.constant 0 : index
    %c0_8 = arith.constant 0 : index
    %c0_9 = arith.constant 0 : index
    %63 = vector.load %arg4[%c0_7, %c0_8, %c0_9] : memref<1x32x128xf32, #tpu.memory_space<vmem>>, vector<1x32x128xf32>
    %64 = vector.shape_cast %63 : vector<1x32x128xf32> to vector<32x128xf32>
    %65 = vector.shape_cast %62 : vector<32x128xf32> to vector<1x32x128xf32>
    tpu.vector_store %arg4[%c0_7, %c0_8, %c0_9], %65 {strides = array<i32>} : memref<1x32x128xf32, #tpu.memory_space<vmem>>, vector<1x32x128xf32>,
    return
  }
  func.func @transform_0(%arg0: i32) -> (i32, i32, i32) {
    %c0_i32 = arith.constant 0 : i32
    %c0_i32_0 = arith.constant 0 : i32
    %c0_i32_1 = arith.constant 0 : i32
    return %arg0, %c0_i32, %c0_i32_0 : i32, i32, i32
  }
  func.func @transform_1(%arg0: i32) -> (i32, i32) {
    %c0_i32 = arith.constant 0 : i32
    %c0_i32_0 = arith.constant 0 : i32
    %c0_i32_1 = arith.constant 0 : i32
    return %c0_i32, %c0_i32_0 : i32, i32
  }
  func.func @transform_2(%arg0: i32) -> (i32, i32) {
    %c0_i32 = arith.constant 0 : i32
    %c0_i32_0 = arith.constant 0 : i32
    %c0_i32_1 = arith.constant 0 : i32
    return %c0_i32, %c0_i32_0 : i32, i32
  }
  func.func @transform_3(%arg0: i32) -> (i32, i32, i32) {
    %c0_i32 = arith.constant 0 : i32
    %c0_i32_0 = arith.constant 0 : i32
    %c0_i32_1 = arith.constant 0 : i32
    return %arg0, %c0_i32, %c0_i32_0 : i32, i32, i32
  }
}

</mosaic_0001>

<bundles_post_ra>
// kernel: tpu_custom_call.1
= control target key start
LH: loop header
LB: loop body
LE: loop exit
PB: predicated region body
PF: predicated region fallthrough
CT: control target
= control target key end

     0   :  { %v370_v2 = vmov 0   ;;  %s497_s0 = inlined_call_operand.vmem [shape: f32[1,9,128], index: 0, kind: input, shape index: {}]   ;;  %s498_s1 = inlined_call_operand.vmem [shape: f32[32,9], index: 1, kind: input, shape index: {}]   ;;  %s499_s2 = inlined_call_operand.vmem [shape: f32[32,1], index: 2, kind: input, shape index: {}]   ;;  %s500_s3 = inlined_call_operand.hbm [shape: f32[1,32,128], index: 3, kind: output, shape index: {}]  }
   0x1   :  { %v405_v0 = vld [vmem:[%s498_s1 + $0x10] sm:$0xff]  ;;  %v410_v1 = vld [vmem:[%s498_s1] sm:$0xff]  ;;  %317 = vset.pattern.permute.xlu1 %v370_v2  ;;  %316 = vset.pattern.permute.xlu0 %v370_v2 }
   0x2   :  { %8 = vsyncpa [#allocation3], 0  ;;  %33 = vperm.xlu1 %317, %v405_v0   ;;  %23 = vperm.xlu0 %316, %v410_v1   ;;  %v371_v3 = vmov 1   ;;  %v420_v4 = vld [vmem:[%s498_s1 + $0x18] sm:$0xff]  ;;  %v425_v5 = vld [vmem:[%s498_s1 + $0x8] sm:$0xff]  ;;  %v372_v6 = vmov 2  }
   0x3   :  { %318 = vset.pattern.permute.xlu2 %v371_v3  ;;  %v373_v7 = vmov 3   ;;  %v374_v8 = vmov 4   ;;  %v375_v9 = vmov 5   ;;  %v376_v10 = vmov 6   ;;  %v246_v12 = vld [vmem:[%s499_s2] sm:$0xff]  ;;  %v247_v27 = vld [vmem:[%s499_s2 + $0x8] sm:$0xff] }
   0x4   :  { %47 = vperm.xlu2 %318, %v410_v1   ;;  %v377_v11 = vmov 7   ;;  %v378_v15 = vmov 8   ;;  %v465_v16 = vld [vmem:[%s497_s0] sm:$0xff]  ;;  %v248_v29 = vld [vmem:[%s499_s2 + $0x10] sm:$0xff]  ;;  %v249_v33 = vld [vmem:[%s499_s2 + $0x18] sm:$0xff]  ;;  %s292_s6 = sshll.u32 %s500_s3, 4  ;;  %s293_s6 = int_to_ptr.hbm [resolvable:$true] %s292_s6 }
   0x5   :  { %v62_v17 = vperm.slane %v465_v16, 1  ;;  %v87_v19 = vperm.slane %v465_v16, 2  ;;  %v41_v21 = vperm.slane %v465_v16, 0  ;;  %v112_v47 = vperm.slane %v465_v16, 3  ;;  %s380_s7 = smov 128   ;;  %s381_s8 = smov 8  }
   0xa   :  { %38 = vperm.xlu1 %317, %v420_v4   ;;  %28 = vperm.xlu0 %316, %v425_v5  }
   0xc   :  { %51 = vperm.xlu2 %318, %v425_v5  }
  0x12   :  { %320 = vset.pattern.permute.xlu1 %v371_v3  ;;  %319 = vset.pattern.permute.xlu0 %v371_v3 }
  0x13   :  { %59 = vperm.xlu1 %320, %v420_v4   ;;  %55 = vperm.xlu0 %319, %v405_v0  }
  0x14   :  { %321 = vset.pattern.permute.xlu2 %v372_v6 }
  0x15   :  { %72 = vperm.xlu2 %321, %v410_v1  }
  0x1b   :  { %322 = vset.pattern.permute.xlu1 %v372_v6  ;;  %323 = vset.pattern.permute.xlu0 %v372_v6 }
  0x1c   :  { %76 = vperm.xlu1 %322, %v425_v5   ;;  %84 = vperm.xlu0 %323, %v420_v4  }
  0x1d   :  { %80 = vperm.xlu2 %321, %v405_v0  }
  0x24   :  { %324 = vset.pattern.permute.xlu1 %v373_v7  ;;  %326 = vset.pattern.permute.xlu0 %v374_v8 }
  0x25   :  { %97 = vperm.xlu1 %324, %v410_v1   ;;  %325 = vset.pattern.permute.xlu2 %v373_v7 }
  0x26   :  { %101 = vperm.xlu2 %325, %v425_v5   ;;  %122 = vperm.xlu0 %326, %v410_v1  }
  0x2d   :  { %105 = vperm.xlu1 %324, %v405_v0  }
  0x2e   :  { %109 = vperm.xlu2 %325, %v420_v4   ;;  %330 = vset.pattern.permute.xlu0 %v375_v9 }
  0x2f   :  { %151 = vperm.xlu0 %330, %v425_v5  }
  0x35   :  { %327 = vset.pattern.permute.xlu1 %v374_v8 }
  0x36   :  { %126 = vperm.xlu1 %327, %v425_v5   ;;  %328 = vset.pattern.permute.xlu2 %v374_v8 }
  0x37   :  { %130 = vperm.xlu2 %328, %v405_v0   ;;  %334 = vset.pattern.permute.xlu0 %v376_v10 }
  0x38   :  { %180 = vperm.xlu0 %334, %v405_v0  }
  0x3e   :  { %134 = vperm.xlu1 %327, %v420_v4  }
  0x3f   :  { %329 = vset.pattern.permute.xlu2 %v375_v9 }
  0x40   :  { %147 = vperm.xlu2 %329, %v410_v1   ;;  %337 = vset.pattern.permute.xlu0 %v377_v11 }
  0x41   :  { %209 = vperm.xlu0 %337, %v420_v4  }
  0x46   :  { %331 = vset.pattern.permute.xlu1 %v375_v9 }
  0x47   :  { %155 = vperm.xlu1 %331, %v405_v0  }
  0x48   :  { %159 = vperm.xlu2 %329, %v420_v4  }
  0x49   :  { %340 = vset.pattern.permute.xlu0 %v370_v2 }
  0x4a   :  { %252 = vperm.xlu0 %340, %v246_v12  }
  0x4f   :  { %332 = vset.pattern.permute.xlu1 %v376_v10 }
  0x50   :  { %172 = vperm.xlu1 %332, %v410_v1   ;;  %333 = vset.pattern.permute.xlu2 %v376_v10 }
  0x51   :  { %176 = vperm.xlu2 %333, %v425_v5  }
  0x58   :  { %184 = vperm.xlu1 %332, %v420_v4  }
  0x59   :  { %335 = vset.pattern.permute.xlu2 %v377_v11 }
  0x5a   :  { %197 = vperm.xlu2 %335, %v410_v1  }
  0x5e   :  { %v48_v13 = vpop.permute.xlu2 %47 }
  0x5f   :  { %v63_v20 = vmul.f32 %v62_v17, %v48_v13 }
  0x60   :  { %336 = vset.pattern.permute.xlu1 %v377_v11  ;;  %v137_v11 = vperm.slane %v465_v16, 4 }
  0x61   :  { %201 = vperm.xlu1 %336, %v425_v5  }
  0x62   :  { %205 = vperm.xlu2 %335, %v405_v0  }
  0x66   :  { %v52_v14 = vpop.permute.xlu2 %51 }
  0x67   :  { %v64_v44 = vmul.f32 %v62_v17, %v52_v14 }
  0x69   :  { %338 = vset.pattern.permute.xlu1 %v378_v15 }
  0x6a   :  { %222 = vperm.xlu1 %338, %v410_v1   ;;  %339 = vset.pattern.permute.xlu2 %v378_v15 }
  0x6b   :  { %226 = vperm.xlu2 %339, %v425_v5  }
  0x6f   :  { %v73_v18 = vpop.permute.xlu2 %72 }
  0x70   :  { %v88_v24 = vmul.f32 %v87_v19, %v73_v18 }
  0x72   :  { %230 = vperm.xlu1 %338, %v405_v0  }
  0x73   :  { %234 = vperm.xlu2 %339, %v420_v4  }
  0x74   :  { %v34_v22 = vpop.permute.xlu1 %33  ;;  %v24_v23 = vpop.permute.xlu0 %23 }
  0x75   :  { %v42_v25 = vmul.f32 %v41_v21, %v24_v23  ;;  %v44_v35 = vmul.f32 %v41_v21, %v34_v22 }
  0x77   :  { %v67_v26 = vadd.f32 %v63_v20, %v42_v25  ;;  %v81_v28 = vpop.permute.xlu2 %80 }
  0x78   :  { %v90_v38 = vmul.f32 %v87_v19, %v81_v28 }
  0x79   :  { %v92_v30 = vadd.f32 %v88_v24, %v67_v26 }
  0x7a   :  { %341 = vset.pattern.permute.xlu1 %v370_v2 }
  0x7b   :  { %257 = vperm.xlu1 %341, %v247_v27   ;;  %342 = vset.pattern.permute.xlu2 %v370_v2 }
  0x7c   :  { %v39_v31 = vpop.permute.xlu1 %38  ;;  %v29_v32 = vpop.permute.xlu0 %28  ;;  %262 = vperm.xlu2 %342, %v248_v29   ;;  %v212_v29 = vperm.slane %v465_v16, 7 }
  0x7d   :  { %v45_v39 = vmul.f32 %v41_v21, %v39_v31  ;;  %v43_v45 = vmul.f32 %v41_v21, %v29_v32  ;;  %v187_v21 = vperm.slane %v465_v16, 6 }
  0x7f   :  { %v68_v49 = vadd.f32 %v64_v44, %v43_v45 }
  0x80   :  { %v102_v34 = vpop.permute.xlu2 %101 }
  0x81   :  { %v114_v52 = vmul.f32 %v112_v47, %v102_v34 }
  0x83   :  { %267 = vperm.xlu1 %341, %v249_v33  }
  0x85   :  { %v60_v36 = vpop.permute.xlu1 %59  ;;  %v56_v37 = vpop.permute.xlu0 %55 }
  0x86   :  { %v66_v40 = vmul.f32 %v62_v17, %v60_v36  ;;  %v65_v41 = vmul.f32 %v62_v17, %v56_v37  ;;  %v162_v17 = vperm.slane %v465_v16, 5 }
  0x88   :  { %v70_v42 = vadd.f32 %v66_v40, %v45_v39  ;;  %v69_v43 = vadd.f32 %v65_v41, %v44_v35  ;;  %v110_v48 = vpop.permute.xlu2 %109  ;;  %v343_v35 = vld [vmem:[%s497_s0 + $0x8] ss:$0 sm:$0xff]  ;;  %s379_s0 = smov [#allocation2]  }
  0x89   :  { %v116_v53 = vmul.f32 %v112_v47, %v110_v48  ;;  %s290_s30 = sshll.u32 %s379_s0, 4  ;;  %s291_s30 = int_to_ptr.vmem [resolvable:$true] %s290_s30 }
  0x8a   :  { %v94_v46 = vadd.f32 %v90_v38, %v69_v43 }
  0x8e   :  { %v77_v50 = vpop.permute.xlu1 %76  ;;  %v85_v51 = vpop.permute.xlu0 %84 }
  0x8f   :  { %v89_v54 = vmul.f32 %v87_v19, %v77_v50  ;;  %v91_v55 = vmul.f32 %v87_v19, %v85_v51 }
  0x91   :  { %v93_v56 = vadd.f32 %v89_v54, %v68_v49  ;;  %v95_v57 = vadd.f32 %v91_v55, %v70_v42  ;;  %v131_v61 = vpop.permute.xlu2 %130 }
  0x92   :  { %v140_v26 = vmul.f32 %v137_v11, %v131_v61 }
  0x93   :  { %v118_v58 = vadd.f32 %v114_v52, %v93_v56  ;;  %v484_v59 = vadd.f32 %v116_v53, %v95_v57 }
  0x97   :  { %v98_v60 = vpop.permute.xlu1 %97 }
  0x98   :  { %v123_v5 = vpop.permute.xlu0 %122  ;;  %v113_v12 = vmul.f32 %v112_v47, %v98_v60 }
  0x99   :  { %v138_v15 = vmul.f32 %v137_v11, %v123_v5 }
  0x9a   :  { %v148_v63 = vpop.permute.xlu2 %147  ;;  %v117_v14 = vadd.f32 %v113_v12, %v92_v30 }
  0x9b   :  { %v163_v19 = vmul.f32 %v162_v17, %v148_v63 }
  0x9c   :  { %v142_v18 = vadd.f32 %v138_v15, %v117_v14 }
  0x9e   :  { %v167_v27 = vadd.f32 %v163_v19, %v142_v18 }
  0x9f   :  { %v106_v62 = vpop.permute.xlu1 %105 }
  0xa0   :  { %v115_v20 = vmul.f32 %v112_v47, %v106_v62 }
  0xa1   :  { %v152_v8 = vpop.permute.xlu0 %151 }
  0xa2   :  { %v160_v1 = vpop.permute.xlu2 %159  ;;  %v119_v28 = vadd.f32 %v115_v20, %v94_v46  ;;  %v164_v42 = vmul.f32 %v162_v17, %v152_v8 }
  0xa3   :  { %v166_v57 = vmul.f32 %v162_v17, %v160_v1 }
  0xa4   :  { %v144_v34 = vadd.f32 %v140_v26, %v119_v28 }
  0xa8   :  { %v127_v0 = vpop.permute.xlu1 %126 }
  0xa9   :  { %v139_v33 = vmul.f32 %v137_v11, %v127_v0 }
  0xaa   :  { %v181_v13 = vpop.permute.xlu0 %180 }
  0xab   :  { %v177_v3 = vpop.permute.xlu2 %176  ;;  %v190_v38 = vmul.f32 %v187_v21, %v181_v13  ;;  %v143_v41 = vadd.f32 %v139_v33, %v118_v58 }
  0xac   :  { %v189_v49 = vmul.f32 %v187_v21, %v177_v3 }
  0xad   :  { %v168_v48 = vadd.f32 %v164_v42, %v143_v41 }
  0xaf   :  { %v193_v60 = vadd.f32 %v189_v49, %v168_v48 }
  0xb0   :  { %v135_v2 = vpop.permute.xlu1 %134 }
  0xb1   :  { %v141_v50 = vmul.f32 %v137_v11, %v135_v2 }
  0xb3   :  { %v210_v25 = vpop.permute.xlu0 %209  ;;  %v145_v58 = vadd.f32 %v141_v50, %v484_v59 }
  0xb4   :  { %v198_v6 = vpop.permute.xlu2 %197 }
  0xb5   :  { %v213_v31 = vmul.f32 %v212_v29, %v198_v6  ;;  %v170_v6 = vadd.f32 %v166_v57, %v145_v58 }
  0xb9   :  { %v156_v4 = vpop.permute.xlu1 %155 }
  0xba   :  { %v165_v32 = vmul.f32 %v162_v17, %v156_v4 }
  0xbc   :  { %v206_v9 = vpop.permute.xlu2 %205  ;;  %v169_v37 = vadd.f32 %v165_v32, %v144_v34  ;;  %v253_v44 = vpop.permute.xlu0 %252 }
  0xbd   :  { %v215_v46 = vmul.f32 %v212_v29, %v206_v9 }
  0xbe   :  { %v194_v16 = vadd.f32 %v190_v38, %v169_v37 }
  0xc0   :  { %v219_v54 = vadd.f32 %v215_v46, %v194_v16 }
  0xc2   :  { %v173_v7 = vpop.permute.xlu1 %172 }
  0xc3   :  { %v188_v24 = vmul.f32 %v187_v21, %v173_v7  ;;  %v216_v7 = vmul.f32 %v212_v29, %v210_v25 }
  0xc5   :  { %v227_v23 = vpop.permute.xlu2 %226  ;;  %v192_v30 = vadd.f32 %v188_v24, %v167_v27 }
  0xc6   :  { %v239_v63 = vmul.f32 %v343_v35, %v227_v23 }
  0xc7   :  { %v217_v40 = vadd.f32 %v213_v31, %v192_v30 }
  0xca   :  { %v185_v10 = vpop.permute.xlu1 %184 }
  0xcb   :  { %v191_v0 = vmul.f32 %v187_v21, %v185_v10 }
  0xcd   :  { %v235_v43 = vpop.permute.xlu2 %234  ;;  %v195_v2 = vadd.f32 %v191_v0, %v170_v6 }
  0xce   :  { %v241_v13 = vmul.f32 %v343_v35, %v235_v43 }
  0xcf   :  { %v220_v1 = vadd.f32 %v216_v7, %v195_v2 }
  0xd1   :  { %v245_v15 = vadd.f32 %v241_v13, %v220_v1 }
  0xd3   :  { %v202_v22 = vpop.permute.xlu1 %201 }
  0xd4   :  { %v214_v52 = vmul.f32 %v212_v29, %v202_v22 }
  0xd6   :  { %v263_v61 = vpop.permute.xlu2 %262  ;;  %v218_v4 = vadd.f32 %v214_v52, %v193_v60 }
  0xd8   :  { %v243_v8 = vadd.f32 %v239_v63, %v218_v4 }
  0xdc   :  { %v223_v36 = vpop.permute.xlu1 %222 }
  0xdd   :  { %v238_v39 = vmul.f32 %v343_v35, %v223_v36 }
  0xdf   :  { %v242_v45 = vadd.f32 %v238_v39, %v217_v40 }
  0xe1   :  { %v270_v47 = vadd.f32 %v253_v44, %v242_v45 }
  0xe3   :  { %v274_v51 = vmax.f32 %v270_v47, 0.0 }
  0xe4   :  { %v231_v53 = vpop.permute.xlu1 %230 }
  0xe5   :  { %v278_v55 = vmin.f32 %v274_v51, 1.0  ;;  %v240_v56 = vmul.f32 %v343_v35, %v231_v53 }
  0xe7   :  { %282 = vst [vmem:[#allocation2] sm:$0xff] %v278_v55  ;;  %v244_v62 = vadd.f32 %v240_v56, %v219_v54 }
  0xe9   :  { %v272_v5 = vadd.f32 %v263_v61, %v244_v62 }
  0xeb   :  { %v276_v3 = vmax.f32 %v272_v5, 0.0 }
  0xed   :  { %v280_v9 = vmin.f32 %v276_v3, 1.0  ;;  %v258_v11 = vpop.permute.xlu1 %257 }
  0xee   :  { %v271_v12 = vadd.f32 %v258_v11, %v243_v8 }
  0xef   :  { %284 = vst [vmem:[#allocation2 + $0x10] sm:$0xff] %v280_v9 }
  0xf0   :  { %v275_v14 = vmax.f32 %v271_v12, 0.0 }
  0xf2   :  { %v279_v59 = vmin.f32 %v275_v14, 1.0 }
  0xf4   :  { %283 = vst [vmem:[#allocation2 + $0x8] sm:$0xff] %v279_v59 }
  0xf5   :  { %v268_v17 = vpop.permute.xlu1 %267 }
  0xf6   :  { %v273_v18 = vadd.f32 %v268_v17, %v245_v15 }
  0xf8   :  { %v277_v10 = vmax.f32 %v273_v18, 0.0 }
  0xfa   :  { %v281_v19 = vmin.f32 %v277_v10, 1.0 }
  0xfc   :  { %285 = vst [vmem:[#allocation2 + $0x18] sm:$0xff] %v281_v19 }
  0xfd   :  { %298 = dma.vmem_to_hbm [thread:$0]  %s291_s30, 512, %s293_s6, [#allocation3], %s380_s7, %s380_s7, %s381_s8  }
  0xfe   :  { %368 = dma.done.wait [#allocation3], 512  }
  0xff   :  { %369 = vsyncadd [#allocation3], 4294966784 }
 0x100   :  { %303 = vsyncpa [#allocation3], 1 }

</bundles_post_ra>
